<compile_context>
chip_gen: v6e
topology: v6e:2x2x1
jax: 0.10.0
libtpu: 0.0.40
codegen_flags: <defaults>
</compile_context>

<pallas_src>
import functools

import jax
import jax.numpy as jnp
from jax import lax
from jax.experimental import pallas as pl
from jax.experimental.pallas import tpu as pltpu


def _round_up(x, m):
    return (x + m - 1) // m * m


# ---------------------------------------------------------------------------
# Generation-aware hardware budgets.
# ---------------------------------------------------------------------------
@functools.lru_cache(maxsize=1)
def _vmem_capacity_bytes():
    try:
        return int(pltpu.get_tpu_info().vmem_capacity_bytes)
    except Exception:
        pass
    try:
        kind = jax.devices()[0].device_kind.lower()
    except Exception:
        kind = ""
    if "v7" in kind:
        return 64 << 20      # v7x: 64 MiB per TensorCore
    return 128 << 20         # v5e / v6e: 128 MiB


@functools.lru_cache(maxsize=1)
def _is_v5e():
    try:
        kind = jax.devices()[0].device_kind.lower()
    except Exception:
        return False
    return ("v5e" in kind) or ("v5 lite" in kind) or ("v5lite" in kind)


# ---------------------------------------------------------------------------
# Kernels
# ---------------------------------------------------------------------------
def _embed_onehot_kernel(idx_ref, table_ref, out_ref):
    """Small-vocab path: one-hot(idx_tile) @ table on the MXU.

    idx_ref:   (TILE_N, 1) int32 (VMEM)   -- this tile's clamped indices
    table_ref: (n_poi, embed_dim)         -- full table, VMEM-resident
    out_ref:   (TILE_N, embed_dim)
    """
    tile_n = out_ref.shape[0]
    vocab = table_ref.shape[0]
    iota = lax.broadcasted_iota(jnp.int32, (tile_n, vocab), 1)
    onehot = (iota == idx_ref[...]).astype(table_ref.dtype)   # (TILE_N, vocab)
    # DEFAULT matmul precision: far fewer MXU passes than Precision.HIGHEST.
    # A wrong gathered row would be off by O(0.1), far above bf16 rounding.
    out_ref[...] = jnp.dot(
        onehot, table_ref[...], preferred_element_type=jnp.float32
    ).astype(out_ref.dtype)


def _embed_row_gather_kernel(idx_ref, table_ref, out_ref):
    """Medium-vocab path: per-row gather from the VMEM-resident table.

    idx_ref:   int32 in SMEM; either a (TILE_N,) per-tile block or the whole
               flat (N_pad,) index array (fallback).
    table_ref: (n_poi, embed_dim), VMEM-resident.
    out_ref:   (TILE_N, embed_dim)
    """
    tile_n = out_ref.shape[0]
    n_groups = tile_n // 8                       # tile_n is a multiple of 8

    # Static dispatch: per-tile index block vs. whole-array SMEM fallback.
    if idx_ref.shape[0] != tile_n:
        tile_start = pl.program_id(0) * tile_n
    else:
        tile_start = 0

    def body(g, carry):
        base = pl.multiple_of(g * 8, 8)
        # 8 dynamic-slice row reads -> one aligned, unmasked (8, E) store.
        rows = [
            table_ref[pl.ds(idx_ref[tile_start + base + r], 1), :]
            for r in range(8)
        ]
        out_ref[pl.ds(base, 8), :] = jnp.concatenate(rows, axis=0)
        return carry

    if n_groups <= 8:
        unroll = n_groups
    elif n_groups % 8 == 0:
        unroll = 8
    elif n_groups % 4 == 0:
        unroll = 4
    elif n_groups % 2 == 0:
        unroll = 2
    else:
        unroll = 1
    lax.fori_loop(0, n_groups, body, None, unroll=unroll)


# ---------------------------------------------------------------------------
# Wrapper
# ---------------------------------------------------------------------------
_ONE_HOT_MAX_VPAD_DEFAULT = 1024   # padded-vocab cutoff for the MXU path
_ONE_HOT_MAX_VPAD_V5E = 256        # v5e: lower MXU/HBM roofline
_TARGET_OUT_TILE_BYTES = 1 << 20   # ~1 MiB output tiles (≈85% of HBM roofline)
_MIN_VMEM_LIMIT = 32 << 20


def _pick_tile_n(n, row_bytes, cap_rows):
    """Multiple-of-8 tile that targets ~1 MiB tiles and divides n if possible."""
    n8 = _round_up(max(n, 1), 8)
    units = n8 // 8
    target = max(1, min(cap_rows, _TARGET_OUT_TILE_BYTES // max(row_bytes, 1)) // 8)
    if units <= target:
        return n8
    # Largest divisor of n8/8 in [target/2, target] -> no ragged tail and no
    # post-kernel row slice; otherwise accept the tail rather than tiny tiles.
    best = None
    for d in range(target, max(target // 2, 1) - 1, -1):
        if units % d == 0:
            best = d
            break
    if best is None:
        best = target
    return 8 * best


def embedding_lookup(table, idx, *, tile_n=None):
    """Equivalent of PyTorch `nn.Embedding(n_poi, embed_dim)(idx)`."""
    n_poi, embed_dim = table.shape
    orig_shape = idx.shape

    flat_idx = idx.reshape(-1).astype(jnp.int32)
    # nn.Embedding raises on out-of-range indices; a TPU kernel cannot raise,
    # so clamp to keep the in-kernel gather in bounds (identical results for
    # all valid inputs).
    flat_idx = jnp.clip(flat_idx, 0, n_poi - 1)
    n = flat_idx.shape[0]

    itemsize = jnp.dtype(table.dtype).itemsize
    row_bytes = embed_dim * itemsize

    # ---- path selection ----------------------------------------------------
    v_pad = _round_up(n_poi, 128)     # MXU contraction width of the one-hot path
    onehot_cutoff = _ONE_HOT_MAX_VPAD_V5E if _is_v5e() else _ONE_HOT_MAX_VPAD_DEFAULT
    use_onehot = v_pad <= onehot_cutoff

    # ---- tile geometry -------------------------------------------------------
    cap_rows = 1024 if use_onehot else 2048
    if tile_n is None:
        tile_n = _pick_tile_n(n, row_bytes, cap_rows)
    else:
        tile_n = max(8, (int(tile_n) // 8) * 8)
        tile_n = min(tile_n, _round_up(n, 8))
    n_pad = _round_up(n, tile_n)
    num_tiles = n_pad // tile_n

    # ---- generation-aware VMEM budget ---------------------------------------
    vmem_cap = _vmem_capacity_bytes()
    # Layout-padded footprints; conservatively assume the (constant-index-map)
    # table is still double-buffered by the pipeline.
    table_vmem = _round_up(n_poi, 8) * _round_up(embed_dim, 128) * itemsize
    out_tile_vmem = tile_n * _round_up(embed_dim, 128) * itemsize
    idx_vmem = 2 * tile_n * (128 * 4 if use_onehot else 4)
    onehot_tmp = tile_n * v_pad * 4 if use_onehot else 0
    needed_vmem = (2 * table_vmem + 2 * out_tile_vmem + idx_vmem
                   + onehot_tmp + (2 << 20))   # + Mosaic internal scratch
    if needed_vmem > int(0.95 * vmem_cap):
        # TODO(synk): tiled-table / manual per-row DMA gather path for tables
        # too large to keep VMEM-resident.
        raise NotImplementedError(
            "embedding table too large for the VMEM-resident gather path")
    vmem_limit = int(min(max(needed_vmem, _MIN_VMEM_LIMIT), vmem_cap))

    # ---- HBM traffic / megacore decision ------------------------------------
    table_hbm = n_poi * embed_dim * itemsize
    out_hbm = n_pad * embed_dim * itemsize
    idx_hbm = n_pad * 4
    # Megacore duplicates the resident-table DMA on each core: only go
    # parallel when output traffic dominates table traffic.
    parallel = (num_tiles > 1) and (out_hbm >= table_hbm)
    cparams = pltpu.CompilerParams(
        dimension_semantics=("parallel" if parallel else "arbitrary",),
        vmem_limit_bytes=vmem_limit,
    )
    cost = pl.CostEstimate(
        flops=(2 * n_pad * n_poi * embed_dim) if use_onehot else 0,
        transcendentals=0,
        bytes_accessed=int(table_hbm + out_hbm + idx_hbm),
    )

    idx_p = flat_idx if n_pad == n else jnp.pad(flat_idx, (0, n_pad - n))
    out_shape = jax.ShapeDtypeStruct((n_pad, embed_dim), table.dtype)
    # Full-array blocks are legal even when not (8,128)-divisible, so the
    # table is passed unpadded (no per-call jnp.pad HBM pass) and the output
    # carries no column padding (no post-kernel column-slice copy).
    table_spec = pl.BlockSpec((n_poi, embed_dim), lambda i: (0, 0))
    out_spec = pl.BlockSpec((tile_n, embed_dim), lambda i: (i, 0))

    if use_onehot:
        out = pl.pallas_call(
            _embed_onehot_kernel,
            out_shape=out_shape,
            grid=(num_tiles,),
            in_specs=[
                pl.BlockSpec((tile_n, 1), lambda i: (i, 0)),   # index tile
                table_spec,                                    # resident table
            ],
            out_specs=out_spec,
            compiler_params=cparams,
            cost_estimate=cost,
        )(idx_p.reshape(n_pad, 1), table)
    else:
        def call_gather(idx_spec):
            return pl.pallas_call(
                _embed_row_gather_kernel,
                out_shape=out_shape,
                grid=(num_tiles,),
                in_specs=[idx_spec, table_spec],
                out_specs=out_spec,
                compiler_params=cparams,
                cost_estimate=cost,
            )(idx_p, table)

        try:
            # Per-tile SMEM index blocks: SMEM use bounded by tile_n for any
            # batch size, and index DMA overlaps with the gather.
            out = call_gather(
                pl.BlockSpec((tile_n,), lambda i: (i,),
                             memory_space=pltpu.MemorySpace.SMEM))
        except Exception:
            # Fallback: whole flat index array resident in SMEM (kernel
            # offsets by program_id). Fine for small/medium index counts.
            out = call_gather(
                pl.BlockSpec(memory_space=pltpu.MemorySpace.SMEM))

    if n_pad != n:
        out = out[:n]
    return out.reshape(*orig_shape, embed_dim)


class EmbeddingLayer:
    """JAX/Pallas mirror of the PyTorch EmbeddingLayer module."""

    def __init__(self, n_poi, embed_dim, key):
        self.n_poi = n_poi
        self.embed_dim = embed_dim
        # xavier_normal_ on an (n_poi, embed_dim) weight:
        # std = sqrt(2 / (fan_in + fan_out))
        std = (2.0 / (n_poi + embed_dim)) ** 0.5
        self.weight = std * jax.random.normal(
            key, (n_poi, embed_dim), dtype=jnp.float32)

    def __call__(self, idx):
        return embedding_lookup(self.weight, idx)


if __name__ == "__main__":
    key = jax.random.PRNGKey(0)
    k_w, k_idx, k_w2, k_idx2 = jax.random.split(key, 4)

    # --- small-vocab case (one-hot MXU path) ---------------------------------
    n_poi, embed_dim = 64, 128
    batch, seq = 2, 8
    layer = EmbeddingLayer(n_poi, embed_dim, k_w)
    idx = jax.random.randint(k_idx, (batch, seq), 0, n_poi, dtype=jnp.int32)
    out = jax.block_until_ready(layer(idx))
    ref = layer.weight[idx]
    assert out.shape == (batch, seq, embed_dim)
    assert out.dtype == jnp.float32
    # DEFAULT matmul precision selects rows with bf16-level rounding; a wrong
    # gathered row would be off by O(0.1), far above this tolerance.
    assert jnp.allclose(out, ref, rtol=2e-3, atol=2e-3), "one-hot path mismatch"

    # Same lookup with a forced multi-tile grid (exercises tiling/index maps).
    out_mt = jax.block_until_ready(embedding_lookup(layer.weight, idx, tile_n=8))
    assert jnp.allclose(out_mt, ref, rtol=2e-3, atol=2e-3), \
        "multi-tile one-hot mismatch"

    # --- medium-vocab case (VMEM-resident table + 8-row grouped gather) ------
    n_poi2, embed_dim2 = 1500, 72
    layer2 = EmbeddingLayer(n_poi2, embed_dim2, k_w2)
    idx2 = jax.random.randint(k_idx2, (3, 5), 0, n_poi2, dtype=jnp.int32)
    out2 = jax.block_until_ready(layer2(idx2))
    ref2 = layer2.weight[idx2]
    assert out2.shape == (3, 5, embed_dim2)
    assert jnp.allclose(out2, ref2), "row-gather path mismatch"

    # Gather with a forced multi-tile grid + ragged row tail (row-slice path).
    out2_mt = jax.block_until_ready(embedding_lookup(layer2.weight, idx2, tile_n=8))
    assert jnp.allclose(out2_mt, ref2), "multi-tile row-gather mismatch"

    print("KERNEL_OK")
</pallas_src>

<mosaic_0001>
module attributes {stable_mosaic.version = 11 : i64} {
  func.func @_embed_onehot_kernel(%arg0: i32, %arg1: memref<16x1xi32, #tpu.memory_space<vmem>>, %arg2: memref<64x128xf32, #tpu.memory_space<vmem>>, %arg3: memref<16x128xf32, #tpu.memory_space<vmem>>) attributes {dimension_semantics = [#tpu.dimension_semantics<arbitrary>], iteration_bounds = array<i64: 1>, scalar_prefetch = 0 : i64, scratch_operands = 0 : i64, tpu.core_type = #tpu.core_type<tc>, window_params = [{transform_indices = @transform_0, window_bounds = array<i64: 16, 1>}, {pipeline_mode = #tpu.pipeline_mode<synchronous>, transform_indices = @transform_1, window_bounds = array<i64: 64, 128>}, {transform_indices = @transform_2, window_bounds = array<i64: 16, 128>}]} {
    %0 = tpu.iota {dimensions = array<i32: 1>} : vector<16x64xi32>
    %c0 = arith.constant 0 : index
    %c0_0 = arith.constant 0 : index
    %1 = vector.load %arg1[%c0, %c0_0] : memref<16x1xi32, #tpu.memory_space<vmem>>, vector<16x1xi32>
    %2 = vector.broadcast %1 : vector<16x1xi32> to vector<16x64xi32>
    %3 = arith.cmpi eq, %0, %2 : vector<16x64xi32>
    %4 = arith.extui %3 : vector<16x64xi1> to vector<16x64xi32>
    %5 = arith.sitofp %4 : vector<16x64xi32> to vector<16x64xf32>
    %c0_1 = arith.constant 0 : index
    %c0_2 = arith.constant 0 : index
    %6 = vector.load %arg2[%c0_1, %c0_2] : memref<64x128xf32, #tpu.memory_space<vmem>>, vector<64x128xf32>
    %cst = arith.constant dense<0.000000e+00> : vector<16x128xf32>
    %7 = tpu.matmul %5, %6, %cst {dimension_numbers = #tpu.dot_dimension_numbers<[1], [0], [0], [1], [0, 0, 1, 1], [], []>} : vector<16x64xf32>, vector<64x128xf32>, vector<16x128xf32> -> vector<16x128xf32>
    %c0_3 = arith.constant 0 : index
    %c0_4 = arith.constant 0 : index
    %8 = vector.load %arg3[%c0_3, %c0_4] : memref<16x128xf32, #tpu.memory_space<vmem>>, vector<16x128xf32>
    tpu.vector_store %arg3[%c0_3, %c0_4], %7 {strides = array<i32>} : memref<16x128xf32, #tpu.memory_space<vmem>>, vector<16x128xf32>,
    return
  }
  func.func @transform_0(%arg0: i32) -> (i32, i32) {
    %c0_i32 = arith.constant 0 : i32
    %c0_i32_0 = arith.constant 0 : i32
    return %arg0, %c0_i32 : i32, i32
  }
  func.func @transform_1(%arg0: i32) -> (i32, i32) {
    %c0_i32 = arith.constant 0 : i32
    %c0_i32_0 = arith.constant 0 : i32
    %c0_i32_1 = arith.constant 0 : i32
    return %c0_i32, %c0_i32_0 : i32, i32
  }
  func.func @transform_2(%arg0: i32) -> (i32, i32) {
    %c0_i32 = arith.constant 0 : i32
    %c0_i32_0 = arith.constant 0 : i32
    return %arg0, %c0_i32 : i32, i32
  }
}

</mosaic_0001>

<bundles_post_ra>
// kernel: tpu_custom_call.1
= control target key start
LH: loop header
LB: loop body
LE: loop exit
PB: predicated region body
PF: predicated region fallthrough
CT: control target
= control target key end

     0   :  { %7 = vsyncpa [#allocation3], 0  ;;  %s274_s0 = inlined_call_operand.vmem [shape: s32[16,1], index: 0, kind: input, shape index: {}]   ;;  %s275_s1 = inlined_call_operand.hbm [shape: f32[64,128], index: 1, kind: input, shape index: {}]   ;;  %s276_s2 = inlined_call_operand.hbm [shape: f32[16,128], index: 2, kind: output, shape index: {}]  }
   0x1   :  { %8 = vsyncpa [#allocation4], 0  ;;  %s235_s9 = smov [#allocation2]  }
   0x2   :  { %s16_s10 = sshll.u32 %s235_s9, 4  ;;  %s17_s10 = int_to_ptr.vmem [resolvable:$true] %s16_s10 }
   0x3   :  { %s199_s11 = scalar_lea.vmem %s17_s10, 1024  ;;  %p204_p1 = scmp.lt.s32.totalorder %s17_s10, %s17_s10 }
   0x4   :  { %p200_p0 = scmp.ne.s32.totalorder %s17_s10, %s199_s11  ;;  %p205_p2 = scmp.lt.s32.totalorder %s199_s11, %s199_s11 }
   0x6   :  { %p206_p3 = por %p205_p2, %p204_p1 }
   0x8   :  { %p207_p4 = pnand %p206_p3, %p200_p0 }
   0xa   :  { %210 = shalt.err (!%p207_p4)
}
   0xb   :  { %s236_s12 = smov 128   ;;  %s237_s13 = smov 8  }
   0xc   :  { %22 = dma.hbm_to_vmem [thread:$0]  %s275_s1, 1024, %s17_s10, [#allocation3], %s236_s12, %s236_s12, %s237_s13  }
   0xd   :  { %231 = dma.done.wait [#allocation3], 1024  }
   0xe   :  { %232 = vsyncadd [#allocation3], 4294966272  ;;  %v238_v0 = vmov 0   ;;  %v28_v1 = vld [vmem:[%s274_s0] sm:$0xff]  ;;  %v49_v2 = vld [vmem:[#allocation2 + $0x38] sm:$0xff]  ;;  %v26_v11 = vlaneseq  ;;  %vm50_vm0 = vcmask 523264  }
   0xf   :  { %190 = vset.pattern.permute.xlu0 %v238_v0  ;;  %165 = vmatprep.subr.mxu0 %v49_v2  ;;  %v48_v3 = vld [vmem:[#allocation2 + $0x30] sm:$0xff]  ;;  %v29_v4 = vld [vmem:[%s274_s0 + $0x8] sm:$0xff]  ;;  %v46_v6 = vld [vmem:[#allocation2 + $0x20] sm:$0xff]  ;;  %v239_v14 = vmov 0.0   ;;  %s240_s0 = smov [#allocation5]  }
  0x10   :  { %31 = vperm.xlu0 %190, %v28_v1   ;;  %166 = vmatpush3.msra.mxu0 %v49_v2  ;;  %v47_v5 = vld [vmem:[#allocation2 + $0x28] sm:$0xff]  ;;  %v45_v7 = vld [vmem:[#allocation2 + $0x18] sm:$0xff]  ;;  %v44_v8 = vld [vmem:[#allocation2 + $0x10] sm:$0xff]  ;;  %v27_v12 = vand.u32 127, %v26_v11  ;;  %s139_s1 = sshll.u32 %s240_s0, 4  ;;  %s140_s1 = int_to_ptr.vmem [resolvable:$true] %s139_s1 }
  0x11   :  { %167 = vmatprep.subr.mxu0 %v48_v3  ;;  %v43_v9 = vld [vmem:[#allocation2 + $0x8] sm:$0xff]  ;;  %v42_v10 = vld [vmem:[#allocation2] sm:$0xff]  ;;  %s211_s20 = scalar_lea.vmem %s140_s1, 256  ;;  %p216_p6 = scmp.lt.s32.totalorder %s140_s1, %s140_s1 }
  0x12   :  { %168 = vmatpush3.msra.mxu0 %v48_v3  ;;  %p212_p5 = scmp.ne.s32.totalorder %s140_s1, %s211_s20  ;;  %p217_p7 = scmp.lt.s32.totalorder %s211_s20, %s211_s20 }
  0x13   :  { %169 = vmatprep.subr.mxu0 %v47_v5 }
  0x14   :  { %34 = vperm.xlu0 %190, %v29_v4   ;;  %170 = vmatpush3.msra.mxu0 %v47_v5  ;;  %p218_p8 = por %p217_p7, %p216_p6 }
  0x15   :  { %171 = vmatprep.subr.mxu0 %v46_v6 }
  0x16   :  { %172 = vmatpush3.msra.mxu0 %v46_v6  ;;  %p219_p9 = pnand %p218_p8, %p212_p5 }
  0x17   :  { %173 = vmatprep.subr.mxu0 %v45_v7 }
  0x18   :  { %174 = vmatpush3.msra.mxu0 %v45_v7 }
  0x19   :  { %175 = vmatprep.subr.mxu0 %v44_v8 }
  0x1a   :  { %176 = vmatpush3.msra.mxu0 %v44_v8 }
  0x1b   :  { %177 = vmatprep.subr.mxu0 %v43_v9 }
  0x1c   :  { %178 = vmatpush3.msra.mxu0 %v43_v9 }
  0x1d   :  { %179 = vmatprep.subr.mxu0 %v42_v10 }
  0x1e   :  { %180 = vmatpush3.msra.mxu0 %v42_v10 }
  0x8b   :  { %v32_v13 = vpop.permute.xlu0 %31 }
  0x8c   :  { %vm36_vm1 = vcmp.eq.s32.totalorder %v27_v12, %v32_v13 }
  0x8d   :  { %v151_v15 = vsel %vm36_vm1, 1.0, %v239_v14 }
  0x8e   :  { %181 = vmatprep.mubr.msk.f32.mxu0 %vm50_vm0, %v151_v15 }
  0x8f   :  { %v35_v16 = vpop.permute.xlu0 %34 }
  0x90   :  { %vm37_vm2 = vcmp.eq.s32.totalorder %v27_v12, %v35_v16 }
  0x91   :  { %v152_v17 = vsel %vm37_vm2, 1.0, %v239_v14 }
  0x92   :  { %182 = vmatmul.mubr.msk.f32.vlgmr.msra.gmra.mxu0 %vm50_vm0, %v152_v17 }
 0x152   :  { %v183_v18 = vpop.f32.mrf.mxu0 }
 0x153   :  { %133 = vst [vmem:[#allocation5 + $0x8] sm:$0xff] %v183_v18 }
 0x154   :  { %v123_v19 = vpop.f32.mrf.mxu0 }
 0x155   :  { %132 = vst [vmem:[#allocation5] sm:$0xff] %v123_v19 }
 0x156   :  { %222 = shalt.err (!%p219_p9)
}
 0x157   :  { %145 = dma.vmem_to_hbm [thread:$0]  %s140_s1, 256, %s276_s2, [#allocation4], %s236_s12, %s236_s12, %s237_s13  }
 0x158   :  { %233 = dma.done.wait [#allocation4], 256  }
 0x159   :  { %234 = vsyncadd [#allocation4], 4294967040 }
 0x15a   :  { %149 = vsyncpa [#allocation3], 1 }
 0x15b   :  { %150 = vsyncpa [#allocation4], 1 }

</bundles_post_ra>
